<compile_context>
chip_gen: v6e
topology: v6e:2x2x1
jax: 0.10.0
libtpu: 0.0.40
codegen_flags: <defaults>
</compile_context>

<pallas_src>
import jax
import jax.numpy as jnp
from jax.experimental import pallas as pl
from jax.experimental.pallas import tpu as pltpu


def _round_up(x, m):
    return (x + m - 1) // m * m


def _pick_tiles(n_s, n_w, ts_target, tw_target):
    n_s_p = _round_up(max(n_s, 1), 128)
    n_w_p = _round_up(max(n_w, 1), 128)

    ts = min(ts_target, n_s_p)
    # Keep >= 2 sentence-row tiles when the graph allows it so the "parallel"
    # N_s axis can be split across v7x's two TensorCores.
    if n_s_p > 128 and n_s_p // ts < 2:
        ts = _round_up(max(n_s_p // 2, 128), 128)

    tw = min(tw_target, n_w_p)

    n_s_p = _round_up(n_s_p, ts)
    n_w_p = _round_up(n_w_p, tw)
    return n_s_p, n_w_p, ts, tw


def pack_adjacency(adj_sw, n_s_p, n_w_p):
    """Pad the 0/1 word->sentence adjacency and store it as int8 (exact).

    In a real pipeline this should be computed ONCE per graph and reused:
    the padded copy is a full read+write of the dominant array.
    """
    n_s, n_w = adj_sw.shape
    return jnp.zeros((n_s_p, n_w_p), jnp.int8).at[:n_s, :n_w].set(
        adj_sw.astype(jnp.int8))


# ---------- stage 1: Y = X @ W^T  (project word features; small) -------------
def xw_kernel(x_ref, wt_ref, y_ref):
    y_ref[...] = jnp.dot(
        x_ref[...], wt_ref[...], preferred_element_type=jnp.float32
    ).astype(y_ref.dtype)  # bf16 store


# ---------- stage 2: O = A @ Y + b  (sum over word in-neighbours, tiled) ------
def _make_agg_kernel(tw, y_resident):
    def agg_kernel(a_ref, y_ref, b_ref, o_ref):
        k = pl.program_id(1)

        @pl.when(k == 0)
        def _():
            # Fold the bias into the init; accumulate directly into the
            # resident f32 output block (no separate scratch accumulator).
            o_ref[...] = jnp.broadcast_to(b_ref[...], o_ref.shape)

        if y_resident:
            off = pl.multiple_of(k * tw, tw)
            y = y_ref[pl.ds(off, tw), :]
        else:
            y = y_ref[...]

        # int8 0/1 adjacency widened to bf16 on the VPU (exact);
        # bf16 x bf16 MXU matmul with f32 accumulation.
        a = a_ref[...].astype(jnp.bfloat16)
        o_ref[...] += jnp.dot(a, y, preferred_element_type=jnp.float32)

    return agg_kernel


def wsgcn_layer(adj_sw, feature, weight, bias, *, ts_target=1024, tw_target=2048):
    """adj_sw: (N_s, N_w) 0/1 f32, feature: (N_w, F_in) f32,
    weight: (F_out, F_in) f32, bias: (F_out,) f32  ->  (N_s, F_out) f32."""
    n_s, n_w = adj_sw.shape
    f_in = feature.shape[1]
    f_out = weight.shape[0]

    f_in_p = _round_up(f_in, 128)
    f_out_p = _round_up(f_out, 128)
    n_s_p, n_w_p, ts, tw = _pick_tiles(n_s, n_w, ts_target, tw_target)

    # ---- host-side layout plumbing (in a real pipeline, hoist per-graph) ----
    x_p = jnp.zeros((n_w_p, f_in_p), jnp.float32).at[:n_w, :f_in].set(feature)
    wt_p = jnp.zeros((f_in_p, f_out_p), jnp.float32).at[:f_in, :f_out].set(weight.T)
    b_p = jnp.zeros((1, f_out_p), jnp.float32).at[0, :f_out].set(bias)
    a_p = pack_adjacency(adj_sw, n_s_p, n_w_p)

    # ---- stage 1: Y = X @ W^T  -> bf16 (N_w_p, F_out_p), W^T resident -------
    vmem1 = (2 * tw * f_in_p * 4          # X tiles, f32, double-buffered
             + 2 * f_in_p * f_out_p * 4   # resident W^T, f32
             + 2 * tw * f_out_p * 2)      # Y tiles, bf16
    vmem1_limit = int(min(48 * 1024 * 1024, max(1.5 * vmem1, 16 * 1024 * 1024)))

    y = pl.pallas_call(
        xw_kernel,
        out_shape=jax.ShapeDtypeStruct((n_w_p, f_out_p), jnp.bfloat16),
        grid_spec=pltpu.PrefetchScalarGridSpec(
            num_scalar_prefetch=0,
            grid=(n_w_p // tw,),
            in_specs=[
                pl.BlockSpec((tw, f_in_p), lambda i: (i, 0)),
                pl.BlockSpec((f_in_p, f_out_p), lambda i: (0, 0)),  # resident
            ],
            out_specs=pl.BlockSpec((tw, f_out_p), lambda i: (i, 0)),
        ),
        compiler_params=pltpu.CompilerParams(
            dimension_semantics=("parallel",),
            vmem_limit_bytes=vmem1_limit,
        ),
    )(x_p, wt_p)

    # ---- stage 2: O = A @ Y + b, grid (N_s tiles, N_w tiles) ----------------
    y_bytes = n_w_p * f_out_p * 2
    y_resident = y_bytes <= 16 * 1024 * 1024  # keep all of Y in VMEM when it fits
    if y_resident:
        y_spec = pl.BlockSpec((n_w_p, f_out_p), lambda i, k: (0, 0))
    else:
        y_spec = pl.BlockSpec((tw, f_out_p), lambda i, k: (k, 0))

    vmem2 = (2 * ts * tw * 1                                    # A tiles, int8
             + (y_bytes if y_resident else 2 * tw * f_out_p * 2)
             + 2 * ts * f_out_p * 4                             # resident O block
             + 2 * f_out_p * 4)                                 # bias
    vmem2_limit = int(min(48 * 1024 * 1024, max(1.5 * vmem2, 16 * 1024 * 1024)))

    out_p = pl.pallas_call(
        _make_agg_kernel(tw, y_resident),
        out_shape=jax.ShapeDtypeStruct((n_s_p, f_out_p), jnp.float32),
        grid_spec=pltpu.PrefetchScalarGridSpec(
            num_scalar_prefetch=0,
            grid=(n_s_p // ts, n_w_p // tw),                    # reduction axis last
            in_specs=[
                pl.BlockSpec((ts, tw), lambda i, k: (i, k)),    # A (int8)
                y_spec,                                         # Y (bf16)
                pl.BlockSpec((1, f_out_p), lambda i, k: (0, 0)),  # bias, resident
            ],
            out_specs=pl.BlockSpec((ts, f_out_p), lambda i, k: (i, 0)),
        ),
        compiler_params=pltpu.CompilerParams(
            dimension_semantics=("parallel", "arbitrary"),
            vmem_limit_bytes=vmem2_limit,
        ),
    )(a_p, y, b_p)

    # un-pad: only real sentence rows / real output features
    return out_p[:n_s, :f_out]


if __name__ == "__main__":
    key = jax.random.PRNGKey(0)
    k_feat, k_adj, k_w, k_b = jax.random.split(key, 4)

    # Small synthetic word->sentence graph: 16 word nodes, 8 sentence nodes.
    N_W, N_S = 16, 8
    IN_FEATS, OUT_FEATS = 32, 16

    # word-node features
    feature = jax.random.normal(k_feat, (N_W, IN_FEATS), dtype=jnp.float32)

    # dense word->sentence adjacency (A[s, w] = 1 iff edge w -> s)
    adj_sw = (jax.random.uniform(k_adj, (N_S, N_W)) < 0.3).astype(jnp.float32)

    # nn.Linear(in_feats, out_feats) params, PyTorch-style uniform init
    bound = 1.0 / (IN_FEATS ** 0.5)
    weight = jax.random.uniform(
        k_w, (OUT_FEATS, IN_FEATS), minval=-bound, maxval=bound, dtype=jnp.float32)
    bias = jax.random.uniform(
        k_b, (OUT_FEATS,), minval=-bound, maxval=bound, dtype=jnp.float32)

    out = wsgcn_layer(adj_sw, feature, weight, bias)
    out = jax.block_until_ready(out)

    # plain-JAX reference: (A @ X) @ W^T + b at sentence nodes
    ref = (adj_sw @ feature) @ weight.T + bias
    assert out.shape == (N_S, OUT_FEATS)
    # Y is rounded once to bf16 before the exact 0/1-weighted f32 sum.
    assert jnp.allclose(out, ref, atol=5e-2, rtol=5e-2), (
        float(jnp.max(jnp.abs(out - ref))))

    print("KERNEL_OK")
</pallas_src>

<mosaic_0001>
module attributes {stable_mosaic.version = 11 : i64} {
  func.func @xw_kernel(%arg0: i32, %arg1: memref<128x128xf32, #tpu.memory_space<vmem>>, %arg2: memref<128x128xf32, #tpu.memory_space<vmem>>, %arg3: memref<128x128xbf16, #tpu.memory_space<vmem>>) attributes {dimension_semantics = [#tpu.dimension_semantics<parallel>], iteration_bounds = array<i64: 1>, scalar_prefetch = 0 : i64, scratch_operands = 0 : i64, tpu.core_type = #tpu.core_type<tc>, window_params = [{transform_indices = @transform_0, window_bounds = array<i64: 128, 128>}, {pipeline_mode = #tpu.pipeline_mode<synchronous>, transform_indices = @transform_1, window_bounds = array<i64: 128, 128>}, {transform_indices = @transform_2, window_bounds = array<i64: 128, 128>}]} {
    %c0 = arith.constant 0 : index
    %c0_0 = arith.constant 0 : index
    %0 = vector.load %arg1[%c0, %c0_0] : memref<128x128xf32, #tpu.memory_space<vmem>>, vector<128x128xf32>
    %c0_1 = arith.constant 0 : index
    %c0_2 = arith.constant 0 : index
    %1 = vector.load %arg2[%c0_1, %c0_2] : memref<128x128xf32, #tpu.memory_space<vmem>>, vector<128x128xf32>
    %cst = arith.constant dense<0.000000e+00> : vector<128x128xf32>
    %2 = tpu.matmul %0, %1, %cst {dimension_numbers = #tpu.dot_dimension_numbers<[1], [0], [0], [1], [0, 0, 1, 1], [], []>} : vector<128x128xf32>, vector<128x128xf32>, vector<128x128xf32> -> vector<128x128xf32>
    %3 = arith.truncf %2 : vector<128x128xf32> to vector<128x128xbf16>
    %c0_3 = arith.constant 0 : index
    %c0_4 = arith.constant 0 : index
    %4 = vector.load %arg3[%c0_3, %c0_4] : memref<128x128xbf16, #tpu.memory_space<vmem>>, vector<128x128xbf16>
    tpu.vector_store %arg3[%c0_3, %c0_4], %3 {strides = array<i32>} : memref<128x128xbf16, #tpu.memory_space<vmem>>, vector<128x128xbf16>,
    return
  }
  func.func @transform_0(%arg0: i32) -> (i32, i32) {
    %c0_i32 = arith.constant 0 : i32
    %c0_i32_0 = arith.constant 0 : i32
    return %arg0, %c0_i32 : i32, i32
  }
  func.func @transform_1(%arg0: i32) -> (i32, i32) {
    %c0_i32 = arith.constant 0 : i32
    %c0_i32_0 = arith.constant 0 : i32
    %c0_i32_1 = arith.constant 0 : i32
    return %c0_i32, %c0_i32_0 : i32, i32
  }
  func.func @transform_2(%arg0: i32) -> (i32, i32) {
    %c0_i32 = arith.constant 0 : i32
    %c0_i32_0 = arith.constant 0 : i32
    return %arg0, %c0_i32 : i32, i32
  }
}

</mosaic_0001>

<bundles_post_ra>
// kernel: tpu_custom_call.1
= control target key start
LH: loop header
LB: loop body
LE: loop exit
PB: predicated region body
PF: predicated region fallthrough
CT: control target
= control target key end

     0   :  { %7 = vsyncpa [#allocation3], 0  ;;  %s618_s0 = inlined_call_operand.hbm [shape: f32[128,128], index: 0, kind: input, shape index: {}]   ;;  %s619_s1 = inlined_call_operand.hbm [shape: f32[128,128], index: 1, kind: input, shape index: {}]   ;;  %s620_s2 = inlined_call_operand.hbm [shape: bf16[128,128], index: 2, kind: output, shape index: {}]  }
   0x1   :  { %8 = vsyncpa [#allocation6], 0 }
   0x2   :  { %9 = vsyncpa [#allocation4], 0  ;;  %s587_s9 = smov [#allocation2]  }
   0x3   :  { %s15_s10 = sshll.u32 %s587_s9, 4  ;;  %s16_s10 = int_to_ptr.vmem [resolvable:$true] %s15_s10 }
   0x4   :  { %s529_s11 = scalar_lea.vmem %s16_s10, 2048  ;;  %p534_p1 = scmp.lt.s32.totalorder %s16_s10, %s16_s10 }
   0x5   :  { %p530_p0 = scmp.ne.s32.totalorder %s16_s10, %s529_s11  ;;  %p535_p2 = scmp.lt.s32.totalorder %s529_s11, %s529_s11 }
   0x7   :  { %p536_p3 = por %p535_p2, %p534_p1 }
   0x9   :  { %p537_p4 = pnand %p536_p3, %p530_p0 }
   0xb   :  { %540 = shalt.err (!%p537_p4)
}
   0xc   :  { %s588_s12 = smov 128   ;;  %s589_s13 = smov 8  }
   0xd   :  { %21 = dma.hbm_to_vmem [thread:$0]  %s618_s0, 2048, %s16_s10, [#allocation3], %s588_s12, %s588_s12, %s589_s13  }
   0xe   :  { %s590_s16 = smov [#allocation5]  }
   0xf   :  { %s27_s17 = sshll.u32 %s590_s16, 4  ;;  %s28_s17 = int_to_ptr.vmem [resolvable:$true] %s27_s17 }
  0x10   :  { %s549_s18 = scalar_lea.vmem %s28_s17, 2048  ;;  %p554_p6 = scmp.lt.s32.totalorder %s28_s17, %s28_s17 }
  0x11   :  { %p550_p5 = scmp.ne.s32.totalorder %s28_s17, %s549_s18  ;;  %p555_p7 = scmp.lt.s32.totalorder %s549_s18, %s549_s18 }
  0x13   :  { %p556_p8 = por %p555_p7, %p554_p6 }
  0x15   :  { %p557_p9 = pnand %p556_p8, %p550_p5 }
  0x17   :  { %560 = shalt.err (!%p557_p9)
}
  0x18   :  { %33 = dma.hbm_to_vmem [thread:$0]  %s619_s1, 2048, %s28_s17, [#allocation6], %s588_s12, %s588_s12, %s589_s13  }
  0x19   :  { %581 = dma.done.wait [#allocation3], 2048  }
  0x1a   :  { %582 = vsyncadd [#allocation3], 4294965248 }
  0x1b   :  { %583 = dma.done.wait [#allocation6], 2048  }
  0x1c   :  { %584 = vsyncadd [#allocation6], 4294965248  ;;  %v71_v0 = vld [vmem:[#allocation5 + $0x78] sm:$0xff]  ;;  %v70_v1 = vld [vmem:[#allocation5 + $0x70] sm:$0xff]  ;;  %s591_s0 = smov [#allocation7]  }
  0x1d   :  { %426 = vmatprep.subr.mxu0 %v71_v0  ;;  %482 = vmatprep.subr.mxu1 %v71_v0  ;;  %v69_v2 = vld [vmem:[#allocation5 + $0x68] sm:$0xff]  ;;  %v68_v3 = vld [vmem:[#allocation5 + $0x60] sm:$0xff]  ;;  %v67_v4 = vld [vmem:[#allocation5 + $0x58] sm:$0xff]  ;;  %s302_s1 = sshll.u32 %s591_s0, 4  ;;  %s303_s1 = int_to_ptr.vmem [resolvable:$true] %s302_s1 }
  0x1e   :  { %427 = vmatpush3.msra.mxu0 %v71_v0  ;;  %498 = vmatpush3.msra.mxu1 %v71_v0  ;;  %v66_v5 = vld [vmem:[#allocation5 + $0x50] sm:$0xff]  ;;  %v65_v6 = vld [vmem:[#allocation5 + $0x48] sm:$0xff]  ;;  %v64_v7 = vld [vmem:[#allocation5 + $0x40] sm:$0xff]  ;;  %s561_s21 = scalar_lea.vmem %s303_s1, 1024  ;;  %p566_p11 = scmp.lt.s32.totalorder %s303_s1, %s303_s1 }
  0x1f   :  { %428 = vmatprep.subr.mxu0 %v70_v1  ;;  %483 = vmatprep.subr.mxu1 %v70_v1  ;;  %v63_v8 = vld [vmem:[#allocation5 + $0x38] sm:$0xff]  ;;  %v62_v9 = vld [vmem:[#allocation5 + $0x30] sm:$0xff]  ;;  %v61_v10 = vld [vmem:[#allocation5 + $0x28] sm:$0xff]  ;;  %p562_p10 = scmp.ne.s32.totalorder %s303_s1, %s561_s21  ;;  %p567_p12 = scmp.lt.s32.totalorder %s561_s21, %s561_s21 }
  0x20   :  { %429 = vmatpush3.msra.mxu0 %v70_v1  ;;  %499 = vmatpush3.msra.mxu1 %v70_v1  ;;  %v60_v11 = vld [vmem:[#allocation5 + $0x20] sm:$0xff]  ;;  %v59_v12 = vld [vmem:[#allocation5 + $0x18] sm:$0xff]  ;;  %v58_v13 = vld [vmem:[#allocation5 + $0x10] sm:$0xff] }
  0x21   :  { %430 = vmatprep.subr.mxu0 %v69_v2  ;;  %484 = vmatprep.subr.mxu1 %v69_v2  ;;  %v57_v14 = vld [vmem:[#allocation5 + $0x8] sm:$0xff]  ;;  %v56_v15 = vld [vmem:[#allocation5] sm:$0xff]  ;;  %v42_v20 = vld [vmem:[#allocation2 + $0x10] sm:$0xff]  ;;  %p568_p13 = por %p567_p12, %p566_p11 }
  0x22   :  { %431 = vmatpush3.msra.mxu0 %v69_v2  ;;  %500 = vmatpush3.msra.mxu1 %v69_v2  ;;  %v40_v16 = vld [vmem:[#allocation2] sm:$0xff]  ;;  %v41_v18 = vld [vmem:[#allocation2 + $0x8] sm:$0xff]  ;;  %v50_v21 = vld [vmem:[#allocation2 + $0x50] sm:$0xff] }
  0x23   :  { %432 = vmatprep.subr.mxu0 %v68_v3  ;;  %485 = vmatprep.subr.mxu1 %v68_v3  ;;  %v48_v17 = vld [vmem:[#allocation2 + $0x40] sm:$0xff]  ;;  %v49_v19 = vld [vmem:[#allocation2 + $0x48] sm:$0xff]  ;;  %v43_v22 = vld [vmem:[#allocation2 + $0x18] sm:$0xff]  ;;  %p569_p0 = pnand %p568_p13, %p562_p10 }
  0x24   :  { %433 = vmatpush3.msra.mxu0 %v68_v3  ;;  %501 = vmatpush3.msra.mxu1 %v68_v3  ;;  %v51_v23 = vld [vmem:[#allocation2 + $0x58] sm:$0xff]  ;;  %v44_v24 = vld [vmem:[#allocation2 + $0x20] sm:$0xff]  ;;  %v45_v26 = vld [vmem:[#allocation2 + $0x28] sm:$0xff] }
  0x25   :  { %434 = vmatprep.subr.mxu0 %v67_v4  ;;  %486 = vmatprep.subr.mxu1 %v67_v4  ;;  %v52_v25 = vld [vmem:[#allocation2 + $0x60] sm:$0xff]  ;;  %v53_v27 = vld [vmem:[#allocation2 + $0x68] sm:$0xff]  ;;  %v46_v28 = vld [vmem:[#allocation2 + $0x30] sm:$0xff] }
  0x26   :  { %435 = vmatpush3.msra.mxu0 %v67_v4  ;;  %502 = vmatpush3.msra.mxu1 %v67_v4  ;;  %v54_v29 = vld [vmem:[#allocation2 + $0x70] sm:$0xff]  ;;  %v47_v30 = vld [vmem:[#allocation2 + $0x38] sm:$0xff] }
  0x27   :  { %436 = vmatprep.subr.mxu0 %v66_v5  ;;  %487 = vmatprep.subr.mxu1 %v66_v5  ;;  %v55_v31 = vld [vmem:[#allocation2 + $0x78] sm:$0xff] }
  0x28   :  { %437 = vmatpush3.msra.mxu0 %v66_v5  ;;  %503 = vmatpush3.msra.mxu1 %v66_v5 }
  0x29   :  { %438 = vmatprep.subr.mxu0 %v65_v6  ;;  %488 = vmatprep.subr.mxu1 %v65_v6 }
  0x2a   :  { %439 = vmatpush3.msra.mxu0 %v65_v6  ;;  %504 = vmatpush3.msra.mxu1 %v65_v6 }
  0x2b   :  { %440 = vmatprep.subr.mxu0 %v64_v7  ;;  %489 = vmatprep.subr.mxu1 %v64_v7 }
  0x2c   :  { %441 = vmatpush3.msra.mxu0 %v64_v7  ;;  %505 = vmatpush3.msra.mxu1 %v64_v7 }
  0x2d   :  { %442 = vmatprep.subr.mxu0 %v63_v8  ;;  %490 = vmatprep.subr.mxu1 %v63_v8 }
  0x2e   :  { %443 = vmatpush3.msra.mxu0 %v63_v8  ;;  %506 = vmatpush3.msra.mxu1 %v63_v8 }
  0x2f   :  { %444 = vmatprep.subr.mxu0 %v62_v9  ;;  %491 = vmatprep.subr.mxu1 %v62_v9 }
  0x30   :  { %445 = vmatpush3.msra.mxu0 %v62_v9  ;;  %507 = vmatpush3.msra.mxu1 %v62_v9 }
  0x31   :  { %446 = vmatprep.subr.mxu0 %v61_v10  ;;  %492 = vmatprep.subr.mxu1 %v61_v10 }
  0x32   :  { %447 = vmatpush3.msra.mxu0 %v61_v10  ;;  %508 = vmatpush3.msra.mxu1 %v61_v10 }
  0x33   :  { %448 = vmatprep.subr.mxu0 %v60_v11  ;;  %493 = vmatprep.subr.mxu1 %v60_v11 }
  0x34   :  { %449 = vmatpush3.msra.mxu0 %v60_v11  ;;  %509 = vmatpush3.msra.mxu1 %v60_v11 }
  0x35   :  { %450 = vmatprep.subr.mxu0 %v59_v12  ;;  %494 = vmatprep.subr.mxu1 %v59_v12 }
  0x36   :  { %451 = vmatpush3.msra.mxu0 %v59_v12  ;;  %510 = vmatpush3.msra.mxu1 %v59_v12 }
  0x37   :  { %452 = vmatprep.subr.mxu0 %v58_v13  ;;  %495 = vmatprep.subr.mxu1 %v58_v13 }
  0x38   :  { %453 = vmatpush3.msra.mxu0 %v58_v13  ;;  %511 = vmatpush3.msra.mxu1 %v58_v13 }
  0x39   :  { %454 = vmatprep.subr.mxu0 %v57_v14  ;;  %496 = vmatprep.subr.mxu1 %v57_v14 }
  0x3a   :  { %455 = vmatpush3.msra.mxu0 %v57_v14  ;;  %512 = vmatpush3.msra.mxu1 %v57_v14 }
  0x3b   :  { %456 = vmatprep.subr.mxu0 %v56_v15  ;;  %497 = vmatprep.subr.mxu1 %v56_v15 }
  0x3c   :  { %457 = vmatpush3.msra.mxu0 %v56_v15  ;;  %513 = vmatpush3.msra.mxu1 %v56_v15 }
  0x3d   :  { %458 = vmatprep.mubr.f32.mxu0 %v40_v16  ;;  %470 = vmatprep.mubr.f32.mxu1 %v48_v17 }
  0x3e   :  { %459 = vmatmul.mubr.f32.vlgmr.msra.gmra.mxu0 %v41_v18  ;;  %471 = vmatmul.mubr.f32.vlgmr.msra.gmra.mxu1 %v49_v19 }
  0x3f   :  { %461 = vmatprep.mubr.f32.mxu0 %v42_v20  ;;  %473 = vmatprep.mubr.f32.mxu1 %v50_v21 }
  0x42   :  { %462 = vmatmul.mubr.f32.gmra.mxu0 %v43_v22  ;;  %474 = vmatmul.mubr.f32.gmra.mxu1 %v51_v23 }
  0x43   :  { %464 = vmatprep.mubr.f32.mxu0 %v44_v24  ;;  %476 = vmatprep.mubr.f32.mxu1 %v52_v25 }
  0x46   :  { %465 = vmatmul.mubr.f32.gmra.mxu0 %v45_v26  ;;  %477 = vmatmul.mubr.f32.gmra.mxu1 %v53_v27 }
  0x47   :  { %467 = vmatprep.mubr.f32.mxu0 %v46_v28  ;;  %479 = vmatprep.mubr.f32.mxu1 %v54_v29 }
  0x4a   :  { %468 = vmatmul.mubr.f32.gmra.mxu0 %v47_v30  ;;  %480 = vmatmul.mubr.f32.gmra.mxu1 %v55_v31 }
  0xfe   :  { %v460_v32 = vpop.f32.mrf.mxu0  ;;  %v472_v33 = vpop.f32.mrf.mxu1 }
 0x100   :  { %v138_v34 = vpop.f32.mrf.mxu0  ;;  %v178_v35 = vpop.f32.mrf.mxu1 }
 0x101   :  { %v350_v36 = vpack.c.bf16 %v460_v32, %v138_v34  ;;  %v370_v37 = vpack.c.bf16 %v472_v33, %v178_v35 }
 0x102   :  { %v463_v38 = vpop.f32.mrf.mxu0  ;;  %v475_v39 = vpop.f32.mrf.mxu1 }
 0x103   :  { %351 = vst [vmem:[#allocation7] sm:$0xff] %v350_v36   ;;  %390 = vst [vmem:[#allocation7 + $0x20] sm:$0xff] %v370_v37  }
 0x104   :  { %v148_v40 = vpop.f32.mrf.mxu0  ;;  %v188_v41 = vpop.f32.mrf.mxu1 }
 0x105   :  { %v355_v42 = vpack.c.bf16 %v463_v38, %v148_v40  ;;  %v375_v43 = vpack.c.bf16 %v475_v39, %v188_v41 }
 0x106   :  { %v466_v44 = vpop.f32.mrf.mxu0  ;;  %v478_v45 = vpop.f32.mrf.mxu1 }
 0x107   :  { %387 = vst [vmem:[#allocation7 + $0x8] sm:$0xff] %v355_v42   ;;  %391 = vst [vmem:[#allocation7 + $0x28] sm:$0xff] %v375_v43  }
 0x108   :  { %v158_v46 = vpop.f32.mrf.mxu0  ;;  %v198_v47 = vpop.f32.mrf.mxu1 }
 0x109   :  { %v360_v48 = vpack.c.bf16 %v466_v44, %v158_v46  ;;  %v380_v49 = vpack.c.bf16 %v478_v45, %v198_v47 }
 0x10a   :  { %v469_v50 = vpop.f32.mrf.mxu0  ;;  %v481_v51 = vpop.f32.mrf.mxu1 }
 0x10b   :  { %388 = vst [vmem:[#allocation7 + $0x10] sm:$0xff] %v360_v48   ;;  %392 = vst [vmem:[#allocation7 + $0x30] sm:$0xff] %v380_v49  }
 0x10c   :  { %v168_v52 = vpop.f32.mrf.mxu0  ;;  %v208_v53 = vpop.f32.mrf.mxu1 }
 0x10d   :  { %v365_v54 = vpack.c.bf16 %v469_v50, %v168_v52  ;;  %v385_v55 = vpack.c.bf16 %v481_v51, %v208_v53 }
 0x10f   :  { %389 = vst [vmem:[#allocation7 + $0x18] sm:$0xff] %v365_v54   ;;  %393 = vst [vmem:[#allocation7 + $0x38] sm:$0xff] %v385_v55  }
 0x110   :  { %572 = shalt.err (!%p569_p0)
}
 0x111   :  { %s592_s22 = smov 64   ;;  %s593_s23 = smov 4  }
 0x112   :  { %308 = dma.vmem_to_hbm [thread:$0]  %s303_s1, 1024, %s620_s2, [#allocation4], %s592_s22, %s592_s22, %s593_s23  }
 0x113   :  { %585 = dma.done.wait [#allocation4], 1024  }
 0x114   :  { %586 = vsyncadd [#allocation4], 4294966272 }
 0x115   :  { %312 = vsyncpa [#allocation3], 1 }
 0x116   :  { %313 = vsyncpa [#allocation6], 1 }
 0x117   :  { %314 = vsyncpa [#allocation4], 1 }

</bundles_post_ra>
